<compile_context>
chip_gen: v7x
topology: tpu7x:2x2x1
jax: 0.10.0
libtpu: 0.0.40
codegen_flags: <defaults>
</compile_context>

<pallas_src>
import numpy as np
import jax
import jax.numpy as jnp
from jax.experimental import pallas as pl
from jax.experimental.pallas import tpu as pltpu

LANE = 128   # lane width of a vreg
SUB = 8      # sublane group


def _round_up(x, m):
    return (x + m - 1) // m * m


# --------------------------- host-side constants -----------------------------

def _conv_tap_masks_ext(H, W, P, cin_pad):
    """(9*cin_pad + SUB, P) mask block.

    Rows [t*cin_pad:(t+1)*cin_pad) repeat the 0/1 mask of tap t = dh*3+dw
    (1 where tap (dh-1, dw-1) lands inside the image => 'same' zero padding is
    done by masking).  Row 9*cin_pad is the constant-1 "bias tap" (only on the
    S = H*W valid lanes); the remaining rows are zero padding to 8 sublanes.
    """
    S = H * W
    rows = 9 * cin_pad + SUB
    m = np.zeros((rows, P), np.float32)
    for dh in range(3):
        for dw in range(3):
            oh, ow = dh - 1, dw - 1
            g = np.zeros((H, W), np.float32)
            g[max(0, -oh):min(H, H - oh), max(0, -ow):min(W, W - ow)] = 1.0
            t = dh * 3 + dw
            m[t * cin_pad:(t + 1) * cin_pad, :S] = g.reshape(-1)[None, :]
    m[9 * cin_pad, :S] = 1.0
    return m


def _pool_select(H, W, P_in, P_out):
    """(P_in, P_out) 0/1 matrix whose column j has exactly one 1, picking the
    top-left lane of pooled output j (stride-2 subsample as an MXU matmul)."""
    Hh, Wh = H // 2, W // 2
    sel = np.zeros((P_in, P_out), np.float32)
    for hh in range(Hh):
        for ww in range(Wh):
            sel[(2 * hh) * W + 2 * ww, hh * Wh + ww] = 1.0
    return sel


# ----------------------------- fused Pallas kernel ---------------------------

def _make_distiller_kernel(stage_cfg, out_cfg):
    """stage_cfg: per-stage dict with static shapes + row offsets into the
    packed constant buffer; out_cfg: out-conv offsets.  All offsets/sizes are
    Python ints, so every c_ref access below is a static, 8/128-aligned slice.
    """

    def kernel(x_ref, c_ref, o_ref):
        x = x_ref[...]                                   # (Cin_pad0, P0)
        for cfg in stage_cfg:
            W, P, Pn = cfg["W"], cfg["P"], cfg["Pn"]
            Cip, Cop, K = cfg["Cip"], cfg["Cop"], cfg["K"]
            o_m, o_p = cfg["o_m"], cfg["o_p"]
            o_w, o_wa, o_wm = cfg["o_w"], cfg["o_wa"], cfg["o_wm"]

            # --- Conv2d(3x3, 'same') + bias + ReLU as ONE im2col matmul ------
            # tap (dh,dw) at output lane s is x[:, s + (dh-1)*W + (dw-1)];
            # out-of-image taps are zeroed by the (pre-broadcast) masks.
            # Taps are built in registers; no cols scratch, no partial stores.
            taps = []
            for dh in range(3):
                for dw in range(3):
                    t = dh * 3 + dw
                    delta = (dh - 1) * W + (dw - 1)
                    shift = (-delta) % P                 # lane s holds x[s+delta]
                    tap = x if shift == 0 else pltpu.roll(x, shift=shift, axis=1)
                    m = c_ref[o_m + t * Cip:o_m + (t + 1) * Cip, 0:P]
                    taps.append(tap * m)
            # bias "tap": constant-1 row (+ zero pad rows), bias lives in w.
            taps.append(c_ref[o_m + 9 * Cip:o_m + K, 0:P])
            cols = jnp.concatenate(taps, axis=0)         # (K, P), 8-aligned pieces

            w = c_ref[o_w:o_w + Cop, 0:K]                # (Cout_pad, K) incl. bias col
            y = jnp.dot(w, cols, preferred_element_type=jnp.float32)
            y = jnp.maximum(y, 0.0)                      # ReLU, (Cout_pad, P)

            # --- FusedPooling: 2x2 avg & max pool + 1x1 conv ------------------
            y01 = pltpu.roll(y, shift=P - 1, axis=1)     # y[h,   w+1]
            y10 = pltpu.roll(y, shift=P - W, axis=1)     # y[h+1, w  ]
            y11 = pltpu.roll(y10, shift=P - 1, axis=1)   # y[h+1, w+1]
            avg = (y + y01 + y10 + y11) * 0.25
            mx = jnp.maximum(jnp.maximum(y, y01), jnp.maximum(y10, y11))

            # 1x1 conv over concat([avg, max]) FIRST (two tiny CxC matmuls),
            # then a single 0/1 column-selection matmul does the stride-2
            # subsample (exact reassociation: one psel matmul instead of two).
            wpa = c_ref[o_wa:o_wa + Cop, 0:Cop]
            wpm = c_ref[o_wm:o_wm + Cop, 0:Cop]
            z = (jnp.dot(wpa, avg, preferred_element_type=jnp.float32) +
                 jnp.dot(wpm, mx, preferred_element_type=jnp.float32))   # (Cop, P)
            psel = c_ref[o_p:o_p + P, 0:Pn]                              # (P, Pn)
            x = jnp.dot(z, psel, preferred_element_type=jnp.float32)     # (Cop, Pn)

        # --- out_conv (1x1) + sigmoid, lane-dense (Pn = 128-wide) ------------
        o_wo, o_bo = out_cfg["o_wo"], out_cfg["o_bo"]
        ncp, clp = out_cfg["nc_pad"], out_cfg["C_last_pad"]
        wo = c_ref[o_wo:o_wo + ncp, 0:clp]               # (nc_pad, C_last_pad)
        bo = c_ref[o_bo:o_bo + ncp, 0:1]                 # (nc_pad, 1)
        logits = jnp.dot(wo, x, preferred_element_type=jnp.float32) + bo
        sig = pl.reciprocal(1.0 + jnp.exp(-logits), approx=False)   # exact, EUP
        if ncp == out_cfg["num_chann"]:
            o_ref[...] = sig
        else:
            o_ref[...] = sig[:out_cfg["num_chann"], :]

    return kernel


# --------------------------- parameters / wrappers ----------------------------

def init_distiller_params(key, num_chann, factor):
    num_ops = int(np.log2(factor))
    blocks = []
    in_ch = 3
    for _ in range(num_ops):
        out_ch = in_ch * 2
        key, k1, k2, k3 = jax.random.split(key, 4)
        wc = jax.random.normal(k1, (3, 3, in_ch, out_ch), jnp.float32) / np.sqrt(9 * in_ch)
        bc = jax.random.normal(k2, (out_ch,), jnp.float32) * 0.01
        wp = jax.random.normal(k3, (2 * out_ch, out_ch), jnp.float32) / np.sqrt(2 * out_ch)
        blocks.append((wc, bc, wp))
        in_ch = out_ch
    key, k1, k2 = jax.random.split(key, 3)
    w_out = jax.random.normal(k1, (in_ch, num_chann), jnp.float32) / np.sqrt(in_ch)
    b_out = jax.random.normal(k2, (num_chann,), jnp.float32) * 0.01
    return {"blocks": blocks, "w_out": w_out, "b_out": b_out}


def prepare_distiller(params, H, W):
    """Pack all weights / masks / selection matrices into ONE lane-dense f32
    constant buffer (static 8-aligned row offsets), precompute static shapes."""
    packed = []     # (np_array, row_offset)
    rows = 0

    def add(a):
        nonlocal rows
        a = np.asarray(a, np.float32)
        assert a.shape[0] % SUB == 0
        off = rows
        packed.append((a, off))
        rows += a.shape[0]
        return off

    stage_cfg = []
    h, w = H, W
    P = _round_up(h * w, LANE)
    for (wc, bc, wp) in params["blocks"]:
        # The roll/mask/psel construction requires even spatial dims and 2x2
        # stride-2 pooling (wrapped lanes are always masked or never selected).
        assert h % 2 == 0 and w % 2 == 0, (h, w)
        assert P % LANE == 0 and P >= h * w
        cin, cout = int(wc.shape[2]), int(wc.shape[3])
        cip, cop = _round_up(cin, SUB), _round_up(cout, SUB)
        K = 9 * cip + SUB

        wcn = np.asarray(wc, np.float32)
        w_flat = np.zeros((cop, K), np.float32)          # (Cout_pad, 9*Cin_pad + 8)
        for dh in range(3):
            for dw in range(3):
                t = dh * 3 + dw
                w_flat[:cout, t * cip:t * cip + cin] = wcn[dh, dw].T   # (cout, cin)
        w_flat[:cout, 9 * cip] = np.asarray(bc, np.float32)            # bias column

        masks = _conv_tap_masks_ext(h, w, P, cip)        # (K, P)
        pooled = (h // 2) * (w // 2)
        Pn = _round_up(pooled, LANE)                     # lane-dense, incl. last stage
        psel = _pool_select(h, w, P, Pn)                 # (P, Pn)

        wpn = np.asarray(wp, np.float32)                 # (2*cout, cout)
        wpa = np.zeros((cop, cop), np.float32)
        wpm = np.zeros((cop, cop), np.float32)
        wpa[:cout, :cout] = wpn[:cout, :].T              # applied to avg-pooled half
        wpm[:cout, :cout] = wpn[cout:, :].T              # applied to max-pooled half

        stage_cfg.append(dict(W=w, P=P, Pn=Pn, Cip=cip, Cop=cop, K=K,
                              o_m=add(masks), o_p=add(psel), o_w=add(w_flat),
                              o_wa=add(wpa), o_wm=add(wpm)))
        h, w, P = h // 2, w // 2, Pn

    c_last = int(params["blocks"][-1][0].shape[3])
    clp = _round_up(c_last, SUB)
    num_chann = int(params["w_out"].shape[1])
    ncp = _round_up(num_chann, SUB)
    wo = np.zeros((ncp, clp), np.float32)
    wo[:num_chann, :c_last] = np.asarray(params["w_out"], np.float32).T
    bo = np.zeros((ncp, 1), np.float32)
    bo[:num_chann, 0] = np.asarray(params["b_out"], np.float32)
    out_cfg = dict(o_wo=add(wo), o_bo=add(bo),
                   nc_pad=ncp, C_last_pad=clp, num_chann=num_chann)

    width = _round_up(max(a.shape[1] for a, _ in packed), LANE)
    consts = np.zeros((rows, width), np.float32)
    for a, off in packed:
        consts[off:off + a.shape[0], :a.shape[1]] = a

    return dict(stage_cfg=stage_cfg, out_cfg=out_cfg,
                consts=jnp.asarray(consts),
                out_hw=(h, w), P_last=P, num_chann=num_chann)


def distiller_forward(x_nchw, kp):
    N, C0, H, W = x_nchw.shape
    cfg = kp["stage_cfg"]
    P0, S0, Cip0 = cfg[0]["P"], H * W, cfg[0]["Cip"]

    # channels-in-sublanes (padded to 8) x flat-spatial-in-lanes (padded to 128)
    x = x_nchw.reshape(N, C0, S0)
    x = jnp.pad(x, ((0, 0), (0, Cip0 - C0), (0, P0 - S0)))

    consts = kp["consts"]
    num_chann = kp["num_chann"]
    P_last = kp["P_last"]
    Hf, Wf = kp["out_hw"]
    S_out = Hf * Wf

    out = pl.pallas_call(
        _make_distiller_kernel(cfg, kp["out_cfg"]),
        out_shape=jax.ShapeDtypeStruct((N, num_chann, P_last), jnp.float32),
        grid=(N,),
        in_specs=[
            pl.BlockSpec((None, Cip0, P0), lambda n: (n, 0, 0)),   # one image
            pl.BlockSpec(consts.shape, lambda n: (0, 0)),          # packed constants
        ],
        out_specs=pl.BlockSpec((None, num_chann, P_last), lambda n: (n, 0, 0)),
        compiler_params=pltpu.CompilerParams(
            dimension_semantics=("parallel",),       # 2 images -> 2 TCs on v7x
            vmem_limit_bytes=32 * 1024 * 1024,
        ),
    )(x, consts)
    # lane-dense kernel output; crop the 128-lane slab to the real spatial size
    return out[:, :, :S_out].reshape(N, num_chann, Hf, Wf)         # NCHW


# ------------------------ pure-JAX reference (NHWC) ---------------------------

def distiller_reference(x, params):
    hi = jax.lax.Precision.HIGHEST
    y = x
    for (wc, bc, wp) in params["blocks"]:
        y = jax.lax.conv_general_dilated(
            y, wc, (1, 1), "SAME",
            dimension_numbers=("NHWC", "HWIO", "NHWC"), precision=hi) + bc
        y = jnp.maximum(y, 0.0)
        ap = jax.lax.reduce_window(y, 0.0, jax.lax.add,
                                   (1, 2, 2, 1), (1, 2, 2, 1), "VALID") * 0.25
        mp = jax.lax.reduce_window(y, -jnp.inf, jax.lax.max,
                                   (1, 2, 2, 1), (1, 2, 2, 1), "VALID")
        y = jnp.einsum("nhwc,cd->nhwd", jnp.concatenate([ap, mp], -1), wp,
                       precision=hi)
    y = jnp.einsum("nhwc,cd->nhwd", y, params["w_out"], precision=hi) + params["b_out"]
    return jax.nn.sigmoid(y)


# ------------------------------------ main -----------------------------------

if __name__ == "__main__":
    N, H, W = 2, 16, 16
    num_chann, factor = 8, 4     # factor=4 -> 2 encoder stages: 3 -> 6 -> 12 channels

    key = jax.random.PRNGKey(0)
    kparam, kx = jax.random.split(key)
    params = init_distiller_params(kparam, num_chann, factor)
    x = jax.random.normal(kx, (N, 3, H, W), jnp.float32)    # NCHW, like torch

    kp = prepare_distiller(params, H, W)
    out = jax.block_until_ready(distiller_forward(x, kp))

    x_nhwc = jnp.transpose(x, (0, 2, 3, 1))
    ref = jnp.transpose(distiller_reference(x_nhwc, params), (0, 3, 1, 2))
    ref = jax.block_until_ready(ref)

    assert out.shape == (N, num_chann, H // factor, W // factor), out.shape
    np.testing.assert_allclose(np.asarray(out), np.asarray(ref), rtol=5e-3, atol=5e-3)

    print("KERNEL_OK")
</pallas_src>

<mosaic_0001>
module attributes {stable_mosaic.version = 11 : i64} {
  func.func @kernel(%arg0: i32, %arg1: memref<1x8x256xf32, #tpu.memory_space<vmem>>, %arg2: memref<632x256xf32, #tpu.memory_space<vmem>>, %arg3: memref<1x8x128xf32, #tpu.memory_space<vmem>>) attributes {dimension_semantics = [#tpu.dimension_semantics<parallel>], iteration_bounds = array<i64: 2>, scalar_prefetch = 0 : i64, scratch_operands = 0 : i64, tpu.core_type = #tpu.core_type<tc>, window_params = [{transform_indices = @transform_0, window_bounds = array<i64: 1, 8, 256>}, {pipeline_mode = #tpu.pipeline_mode<synchronous>, transform_indices = @transform_1, window_bounds = array<i64: 632, 256>}, {transform_indices = @transform_2, window_bounds = array<i64: 1, 8, 128>}]} {
    %c0 = arith.constant 0 : index
    %c0_0 = arith.constant 0 : index
    %c0_1 = arith.constant 0 : index
    %0 = vector.load %arg1[%c0, %c0_0, %c0_1] : memref<1x8x256xf32, #tpu.memory_space<vmem>>, vector<1x8x256xf32>
    %1 = vector.shape_cast %0 : vector<1x8x256xf32> to vector<8x256xf32>
    %c17_i32 = arith.constant 17 : i32
    %2 = tpu.dynamic_rotate %1 by %c17_i32 dim 1 : vector<8x256xf32>, i32 -> vector<8x256xf32>
    %c0_2 = arith.constant 0 : index
    %c0_3 = arith.constant 0 : index
    %3 = vector.load %arg2[%c0_2, %c0_3] : memref<632x256xf32, #tpu.memory_space<vmem>>, vector<8x256xf32>
    %4 = arith.mulf %2, %3 : vector<8x256xf32>
    %c16_i32 = arith.constant 16 : i32
    %5 = tpu.dynamic_rotate %1 by %c16_i32 dim 1 : vector<8x256xf32>, i32 -> vector<8x256xf32>
    %c8 = arith.constant 8 : index
    %c0_4 = arith.constant 0 : index
    %6 = vector.load %arg2[%c8, %c0_4] : memref<632x256xf32, #tpu.memory_space<vmem>>, vector<8x256xf32>
    %7 = arith.mulf %5, %6 : vector<8x256xf32>
    %c15_i32 = arith.constant 15 : i32
    %8 = tpu.dynamic_rotate %1 by %c15_i32 dim 1 : vector<8x256xf32>, i32 -> vector<8x256xf32>
    %c16 = arith.constant 16 : index
    %c0_5 = arith.constant 0 : index
    %9 = vector.load %arg2[%c16, %c0_5] : memref<632x256xf32, #tpu.memory_space<vmem>>, vector<8x256xf32>
    %10 = arith.mulf %8, %9 : vector<8x256xf32>
    %c1_i32 = arith.constant 1 : i32
    %11 = tpu.dynamic_rotate %1 by %c1_i32 dim 1 : vector<8x256xf32>, i32 -> vector<8x256xf32>
    %c24 = arith.constant 24 : index
    %c0_6 = arith.constant 0 : index
    %12 = vector.load %arg2[%c24, %c0_6] : memref<632x256xf32, #tpu.memory_space<vmem>>, vector<8x256xf32>
    %13 = arith.mulf %11, %12 : vector<8x256xf32>
    %c32 = arith.constant 32 : index
    %c0_7 = arith.constant 0 : index
    %14 = vector.load %arg2[%c32, %c0_7] : memref<632x256xf32, #tpu.memory_space<vmem>>, vector<8x256xf32>
    %15 = arith.mulf %1, %14 : vector<8x256xf32>
    %c255_i32 = arith.constant 255 : i32
    %16 = tpu.dynamic_rotate %1 by %c255_i32 dim 1 : vector<8x256xf32>, i32 -> vector<8x256xf32>
    %c40 = arith.constant 40 : index
    %c0_8 = arith.constant 0 : index
    %17 = vector.load %arg2[%c40, %c0_8] : memref<632x256xf32, #tpu.memory_space<vmem>>, vector<8x256xf32>
    %18 = arith.mulf %16, %17 : vector<8x256xf32>
    %c241_i32 = arith.constant 241 : i32
    %19 = tpu.dynamic_rotate %1 by %c241_i32 dim 1 : vector<8x256xf32>, i32 -> vector<8x256xf32>
    %c48 = arith.constant 48 : index
    %c0_9 = arith.constant 0 : index
    %20 = vector.load %arg2[%c48, %c0_9] : memref<632x256xf32, #tpu.memory_space<vmem>>, vector<8x256xf32>
    %21 = arith.mulf %19, %20 : vector<8x256xf32>
    %c240_i32 = arith.constant 240 : i32
    %22 = tpu.dynamic_rotate %1 by %c240_i32 dim 1 : vector<8x256xf32>, i32 -> vector<8x256xf32>
    %c56 = arith.constant 56 : index
    %c0_10 = arith.constant 0 : index
    %23 = vector.load %arg2[%c56, %c0_10] : memref<632x256xf32, #tpu.memory_space<vmem>>, vector<8x256xf32>
    %24 = arith.mulf %22, %23 : vector<8x256xf32>
    %c239_i32 = arith.constant 239 : i32
    %25 = tpu.dynamic_rotate %1 by %c239_i32 dim 1 : vector<8x256xf32>, i32 -> vector<8x256xf32>
    %c64 = arith.constant 64 : index
    %c0_11 = arith.constant 0 : index
    %26 = vector.load %arg2[%c64, %c0_11] : memref<632x256xf32, #tpu.memory_space<vmem>>, vector<8x256xf32>
    %27 = arith.mulf %25, %26 : vector<8x256xf32>
    %c72 = arith.constant 72 : index
    %c0_12 = arith.constant 0 : index
    %28 = vector.load %arg2[%c72, %c0_12] : memref<632x256xf32, #tpu.memory_space<vmem>>, vector<8x256xf32>
    %29 = tpu.concatenate %4, %7, %10, %13, %15, %18, %21, %24, %27, %28 in 0 : vector<8x256xf32>, vector<8x256xf32>, vector<8x256xf32>, vector<8x256xf32>, vector<8x256xf32>, vector<8x256xf32>, vector<8x256xf32>, vector<8x256xf32>, vector<8x256xf32>, vector<8x256xf32> -> vector<80x256xf32>
    %c336 = arith.constant 336 : index
    %c0_13 = arith.constant 0 : index
    %30 = vector.load %arg2[%c336, %c0_13] : memref<632x256xf32, #tpu.memory_space<vmem>>, vector<8x80xf32>
    %cst = arith.constant dense<0.000000e+00> : vector<8x256xf32>
    %31 = tpu.matmul %30, %29, %cst {dimension_numbers = #tpu.dot_dimension_numbers<[1], [0], [0], [1], [0, 0, 1, 1], [], []>} : vector<8x80xf32>, vector<80x256xf32>, vector<8x256xf32> -> vector<8x256xf32>
    %cst_14 = arith.constant 0.000000e+00 : f32
    %32 = vector.broadcast %cst_14 : f32 to vector<8x256xf32>
    %33 = arith.maximumf %31, %32 : vector<8x256xf32>
    %c255_i32_15 = arith.constant 255 : i32
    %34 = tpu.dynamic_rotate %33 by %c255_i32_15 dim 1 : vector<8x256xf32>, i32 -> vector<8x256xf32>
    %c240_i32_16 = arith.constant 240 : i32
    %35 = tpu.dynamic_rotate %33 by %c240_i32_16 dim 1 : vector<8x256xf32>, i32 -> vector<8x256xf32>
    %c255_i32_17 = arith.constant 255 : i32
    %36 = tpu.dynamic_rotate %35 by %c255_i32_17 dim 1 : vector<8x256xf32>, i32 -> vector<8x256xf32>
    %37 = arith.addf %33, %34 : vector<8x256xf32>
    %38 = arith.addf %37, %35 : vector<8x256xf32>
    %39 = arith.addf %38, %36 : vector<8x256xf32>
    %cst_18 = arith.constant 2.500000e-01 : f32
    %40 = vector.broadcast %cst_18 : f32 to vector<8x256xf32>
    %41 = arith.mulf %39, %40 : vector<8x256xf32>
    %42 = arith.maximumf %33, %34 : vector<8x256xf32>
    %43 = arith.maximumf %35, %36 : vector<8x256xf32>
    %44 = arith.maximumf %42, %43 : vector<8x256xf32>
    %c344 = arith.constant 344 : index
    %c0_19 = arith.constant 0 : index
    %45 = vector.load %arg2[%c344, %c0_19] : memref<632x256xf32, #tpu.memory_space<vmem>>, vector<8x8xf32>
    %c352 = arith.constant 352 : index
    %c0_20 = arith.constant 0 : index
    %46 = vector.load %arg2[%c352, %c0_20] : memref<632x256xf32, #tpu.memory_space<vmem>>, vector<8x8xf32>
    %cst_21 = arith.constant dense<0.000000e+00> : vector<8x256xf32>
    %47 = tpu.matmul %45, %41, %cst_21 {dimension_numbers = #tpu.dot_dimension_numbers<[1], [0], [0], [1], [0, 0, 1, 1], [], []>} : vector<8x8xf32>, vector<8x256xf32>, vector<8x256xf32> -> vector<8x256xf32>
    %cst_22 = arith.constant dense<0.000000e+00> : vector<8x256xf32>
    %48 = tpu.matmul %46, %44, %cst_22 {dimension_numbers = #tpu.dot_dimension_numbers<[1], [0], [0], [1], [0, 0, 1, 1], [], []>} : vector<8x8xf32>, vector<8x256xf32>, vector<8x256xf32> -> vector<8x256xf32>
    %49 = arith.addf %47, %48 : vector<8x256xf32>
    %c80 = arith.constant 80 : index
    %c0_23 = arith.constant 0 : index
    %50 = vector.load %arg2[%c80, %c0_23] : memref<632x256xf32, #tpu.memory_space<vmem>>, vector<256x128xf32>
    %cst_24 = arith.constant dense<0.000000e+00> : vector<8x128xf32>
    %51 = tpu.matmul %49, %50, %cst_24 {dimension_numbers = #tpu.dot_dimension_numbers<[1], [0], [0], [1], [0, 0, 1, 1], [], []>} : vector<8x256xf32>, vector<256x128xf32>, vector<8x128xf32> -> vector<8x128xf32>
    %c9_i32 = arith.constant 9 : i32
    %52 = tpu.dynamic_rotate %51 by %c9_i32 dim 1 : vector<8x128xf32>, i32 -> vector<8x128xf32>
    %c360 = arith.constant 360 : index
    %c0_25 = arith.constant 0 : index
    %53 = vector.load %arg2[%c360, %c0_25] : memref<632x256xf32, #tpu.memory_space<vmem>>, vector<8x128xf32>
    %54 = arith.mulf %52, %53 : vector<8x128xf32>
    %c8_i32 = arith.constant 8 : i32
    %55 = tpu.dynamic_rotate %51 by %c8_i32 dim 1 : vector<8x128xf32>, i32 -> vector<8x128xf32>
    %c368 = arith.constant 368 : index
    %c0_26 = arith.constant 0 : index
    %56 = vector.load %arg2[%c368, %c0_26] : memref<632x256xf32, #tpu.memory_space<vmem>>, vector<8x128xf32>
    %57 = arith.mulf %55, %56 : vector<8x128xf32>
    %c7_i32 = arith.constant 7 : i32
    %58 = tpu.dynamic_rotate %51 by %c7_i32 dim 1 : vector<8x128xf32>, i32 -> vector<8x128xf32>
    %c376 = arith.constant 376 : index
    %c0_27 = arith.constant 0 : index
    %59 = vector.load %arg2[%c376, %c0_27] : memref<632x256xf32, #tpu.memory_space<vmem>>, vector<8x128xf32>
    %60 = arith.mulf %58, %59 : vector<8x128xf32>
    %c1_i32_28 = arith.constant 1 : i32
    %61 = tpu.dynamic_rotate %51 by %c1_i32_28 dim 1 : vector<8x128xf32>, i32 -> vector<8x128xf32>
    %c384 = arith.constant 384 : index
    %c0_29 = arith.constant 0 : index
    %62 = vector.load %arg2[%c384, %c0_29] : memref<632x256xf32, #tpu.memory_space<vmem>>, vector<8x128xf32>
    %63 = arith.mulf %61, %62 : vector<8x128xf32>
    %c392 = arith.constant 392 : index
    %c0_30 = arith.constant 0 : index
    %64 = vector.load %arg2[%c392, %c0_30] : memref<632x256xf32, #tpu.memory_space<vmem>>, vector<8x128xf32>
    %65 = arith.mulf %51, %64 : vector<8x128xf32>
    %c127_i32 = arith.constant 127 : i32
    %66 = tpu.dynamic_rotate %51 by %c127_i32 dim 1 : vector<8x128xf32>, i32 -> vector<8x128xf32>
    %c400 = arith.constant 400 : index
    %c0_31 = arith.constant 0 : index
    %67 = vector.load %arg2[%c400, %c0_31] : memref<632x256xf32, #tpu.memory_space<vmem>>, vector<8x128xf32>
    %68 = arith.mulf %66, %67 : vector<8x128xf32>
    %c121_i32 = arith.constant 121 : i32
    %69 = tpu.dynamic_rotate %51 by %c121_i32 dim 1 : vector<8x128xf32>, i32 -> vector<8x128xf32>
    %c408 = arith.constant 408 : index
    %c0_32 = arith.constant 0 : index
    %70 = vector.load %arg2[%c408, %c0_32] : memref<632x256xf32, #tpu.memory_space<vmem>>, vector<8x128xf32>
    %71 = arith.mulf %69, %70 : vector<8x128xf32>
    %c120_i32 = arith.constant 120 : i32
    %72 = tpu.dynamic_rotate %51 by %c120_i32 dim 1 : vector<8x128xf32>, i32 -> vector<8x128xf32>
    %c416 = arith.constant 416 : index
    %c0_33 = arith.constant 0 : index
    %73 = vector.load %arg2[%c416, %c0_33] : memref<632x256xf32, #tpu.memory_space<vmem>>, vector<8x128xf32>
    %74 = arith.mulf %72, %73 : vector<8x128xf32>
    %c119_i32 = arith.constant 119 : i32
    %75 = tpu.dynamic_rotate %51 by %c119_i32 dim 1 : vector<8x128xf32>, i32 -> vector<8x128xf32>
    %c424 = arith.constant 424 : index
    %c0_34 = arith.constant 0 : index
    %76 = vector.load %arg2[%c424, %c0_34] : memref<632x256xf32, #tpu.memory_space<vmem>>, vector<8x128xf32>
    %77 = arith.mulf %75, %76 : vector<8x128xf32>
    %c432 = arith.constant 432 : index
    %c0_35 = arith.constant 0 : index
    %78 = vector.load %arg2[%c432, %c0_35] : memref<632x256xf32, #tpu.memory_space<vmem>>, vector<8x128xf32>
    %79 = tpu.concatenate %54, %57, %60, %63, %65, %68, %71, %74, %77, %78 in 0 : vector<8x128xf32>, vector<8x128xf32>, vector<8x128xf32>, vector<8x128xf32>, vector<8x128xf32>, vector<8x128xf32>, vector<8x128xf32>, vector<8x128xf32>, vector<8x128xf32>, vector<8x128xf32> -> vector<80x128xf32>
    %c568 = arith.constant 568 : index
    %c0_36 = arith.constant 0 : index
    %80 = vector.load %arg2[%c568, %c0_36] : memref<632x256xf32, #tpu.memory_space<vmem>>, vector<16x80xf32>
    %cst_37 = arith.constant dense<0.000000e+00> : vector<16x128xf32>
    %81 = tpu.matmul %80, %79, %cst_37 {dimension_numbers = #tpu.dot_dimension_numbers<[1], [0], [0], [1], [0, 0, 1, 1], [], []>} : vector<16x80xf32>, vector<80x128xf32>, vector<16x128xf32> -> vector<16x128xf32>
    %cst_38 = arith.constant 0.000000e+00 : f32
    %82 = vector.broadcast %cst_38 : f32 to vector<16x128xf32>
    %83 = arith.maximumf %81, %82 : vector<16x128xf32>
    %c127_i32_39 = arith.constant 127 : i32
    %84 = tpu.dynamic_rotate %83 by %c127_i32_39 dim 1 : vector<16x128xf32>, i32 -> vector<16x128xf32>
    %c120_i32_40 = arith.constant 120 : i32
    %85 = tpu.dynamic_rotate %83 by %c120_i32_40 dim 1 : vector<16x128xf32>, i32 -> vector<16x128xf32>
    %c127_i32_41 = arith.constant 127 : i32
    %86 = tpu.dynamic_rotate %85 by %c127_i32_41 dim 1 : vector<16x128xf32>, i32 -> vector<16x128xf32>
    %87 = arith.addf %83, %84 : vector<16x128xf32>
    %88 = arith.addf %87, %85 : vector<16x128xf32>
    %89 = arith.addf %88, %86 : vector<16x128xf32>
    %cst_42 = arith.constant 2.500000e-01 : f32
    %90 = vector.broadcast %cst_42 : f32 to vector<16x128xf32>
    %91 = arith.mulf %89, %90 : vector<16x128xf32>
    %92 = arith.maximumf %83, %84 : vector<16x128xf32>
    %93 = arith.maximumf %85, %86 : vector<16x128xf32>
    %94 = arith.maximumf %92, %93 : vector<16x128xf32>
    %c584 = arith.constant 584 : index
    %c0_43 = arith.constant 0 : index
    %95 = vector.load %arg2[%c584, %c0_43] : memref<632x256xf32, #tpu.memory_space<vmem>>, vector<16x16xf32>
    %c600 = arith.constant 600 : index
    %c0_44 = arith.constant 0 : index
    %96 = vector.load %arg2[%c600, %c0_44] : memref<632x256xf32, #tpu.memory_space<vmem>>, vector<16x16xf32>
    %cst_45 = arith.constant dense<0.000000e+00> : vector<16x128xf32>
    %97 = tpu.matmul %95, %91, %cst_45 {dimension_numbers = #tpu.dot_dimension_numbers<[1], [0], [0], [1], [0, 0, 1, 1], [], []>} : vector<16x16xf32>, vector<16x128xf32>, vector<16x128xf32> -> vector<16x128xf32>
    %cst_46 = arith.constant dense<0.000000e+00> : vector<16x128xf32>
    %98 = tpu.matmul %96, %94, %cst_46 {dimension_numbers = #tpu.dot_dimension_numbers<[1], [0], [0], [1], [0, 0, 1, 1], [], []>} : vector<16x16xf32>, vector<16x128xf32>, vector<16x128xf32> -> vector<16x128xf32>
    %99 = arith.addf %97, %98 : vector<16x128xf32>
    %c440 = arith.constant 440 : index
    %c0_47 = arith.constant 0 : index
    %100 = vector.load %arg2[%c440, %c0_47] : memref<632x256xf32, #tpu.memory_space<vmem>>, vector<128x128xf32>
    %cst_48 = arith.constant dense<0.000000e+00> : vector<16x128xf32>
    %101 = tpu.matmul %99, %100, %cst_48 {dimension_numbers = #tpu.dot_dimension_numbers<[1], [0], [0], [1], [0, 0, 1, 1], [], []>} : vector<16x128xf32>, vector<128x128xf32>, vector<16x128xf32> -> vector<16x128xf32>
    %c616 = arith.constant 616 : index
    %c0_49 = arith.constant 0 : index
    %102 = vector.load %arg2[%c616, %c0_49] : memref<632x256xf32, #tpu.memory_space<vmem>>, vector<8x16xf32>
    %c624 = arith.constant 624 : index
    %c0_50 = arith.constant 0 : index
    %103 = vector.load %arg2[%c624, %c0_50] : memref<632x256xf32, #tpu.memory_space<vmem>>, vector<8x1xf32>
    %cst_51 = arith.constant dense<0.000000e+00> : vector<8x128xf32>
    %104 = tpu.matmul %102, %101, %cst_51 {dimension_numbers = #tpu.dot_dimension_numbers<[1], [0], [0], [1], [0, 0, 1, 1], [], []>} : vector<8x16xf32>, vector<16x128xf32>, vector<8x128xf32> -> vector<8x128xf32>
    %105 = vector.broadcast %103 : vector<8x1xf32> to vector<8x128xf32>
    %106 = arith.addf %104, %105 : vector<8x128xf32>
    %cst_52 = arith.constant 0.000000e+00 : f32
    %107 = vector.broadcast %cst_52 : f32 to vector<8x128xf32>
    %108 = arith.subf %107, %106 : vector<8x128xf32>
    %109 = math.exp %108 : vector<8x128xf32>
    %cst_53 = arith.constant 1.000000e+00 : f32
    %110 = vector.broadcast %cst_53 : f32 to vector<8x128xf32>
    %111 = arith.addf %110, %109 : vector<8x128xf32>
    %112 = tpu.reciprocal %111 : vector<8x128xf32> -> vector<8x128xf32>
    %c0_54 = arith.constant 0 : index
    %c0_55 = arith.constant 0 : index
    %c0_56 = arith.constant 0 : index
    %113 = vector.load %arg3[%c0_54, %c0_55, %c0_56] : memref<1x8x128xf32, #tpu.memory_space<vmem>>, vector<1x8x128xf32>
    %114 = vector.shape_cast %113 : vector<1x8x128xf32> to vector<8x128xf32>
    %115 = vector.shape_cast %112 : vector<8x128xf32> to vector<1x8x128xf32>
    tpu.vector_store %arg3[%c0_54, %c0_55, %c0_56], %115 {strides = array<i32>} : memref<1x8x128xf32, #tpu.memory_space<vmem>>, vector<1x8x128xf32>,
    return
  }
  func.func @transform_0(%arg0: i32) -> (i32, i32, i32) {
    %c0_i32 = arith.constant 0 : i32
    %c0_i32_0 = arith.constant 0 : i32
    %c0_i32_1 = arith.constant 0 : i32
    return %arg0, %c0_i32, %c0_i32_0 : i32, i32, i32
  }
  func.func @transform_1(%arg0: i32) -> (i32, i32) {
    %c0_i32 = arith.constant 0 : i32
    %c0_i32_0 = arith.constant 0 : i32
    %c0_i32_1 = arith.constant 0 : i32
    return %c0_i32, %c0_i32_0 : i32, i32
  }
  func.func @transform_2(%arg0: i32) -> (i32, i32, i32) {
    %c0_i32 = arith.constant 0 : i32
    %c0_i32_0 = arith.constant 0 : i32
    %c0_i32_1 = arith.constant 0 : i32
    return %arg0, %c0_i32, %c0_i32_0 : i32, i32, i32
  }
}

</mosaic_0001>

<bundles_post_ra>
// kernel: tpu_custom_call.1
= control target key start
LH: loop header
LB: loop body
LE: loop exit
PB: predicated region body
PF: predicated region fallthrough
CT: control target
= control target key end

     0   :  { %7 = vsyncpa [#allocation3], 0  ;;  %s2052_s0 = inlined_call_operand.hbm [shape: f32[2,8,256], index: 0, kind: input, shape index: {}]   ;;  %s2053_s1 = inlined_call_operand.hbm [shape: f32[632,256], index: 1, kind: input, shape index: {}]   ;;  %s2054_s2 = inlined_call_operand.hbm [shape: f32[2,8,128], index: 2, kind: output, shape index: {}]  }
   0x1   :  { %9 = vsyncpa [#allocation3 + $0x1], 0 }
   0x2   :  { %10 = vsyncpa [#allocation6], 0 }
   0x3   :  { %11 = vsyncpa [#allocation4], 0 }
   0x4   :  { %13 = vsyncpa [#allocation4 + $0x1], 0  ;;  %s1770_s9 = smov 0   ;;  %s1772_s10 = smov 0  }
   0x5   :  { %s1774_s11 = smov 0   ;;  %s1776_s12 = smov 0  }
   0x6 LB: > { %s1791_s13 = sadd.s32 4294967295, %s1730_s12   ;;  %s1220_s14 = sadd.s32 4294967294, %s1730_s12   ;;  %s1730_s12 = sphi %s1776_s12, %s2074_s12   ;;  %s1726_s11 = sphi %s1774_s11, %s2073_s11   ;;  %s1722_s10 = sphi %s1772_s10, %s2072_s10   ;;  %s1718_s9 = sphi %s1770_s9, %s2071_s9  }
   0x7   : > { %p39_p0 = scmp.ne.s32.totalorder %s1722_s10, %s1718_s9  ;;  %p2055_p1 = scmp.eq.s32.totalorder %s1791_s13, 0 }
   0x8   : > { %p90_p3 = scmp.eq.s32.totalorder %s1220_s14, 1  ;;  %p1221_p5 = scmp.ge.s32.totalorder %s1730_s12, 1 }
   0x9   : > { %p1800_p4 = por %p2055_p1, %p39_p0  ;;  %p97_p7 = scmp.lt.s32.totalorder %s1730_s12, 3 }
   0xa   : > { %p1805_p6 = por %p90_p3, %p39_p0  ;;  %s1732_s18 = smov [#allocation5]  }
   0xb   : > { %s2058_s15 = scalar_select %p1800_p4, 1, 0 }
   0xc   : > { %s2059_s16 = scalar_select %p1805_p6, 1, 0 }
   0xd   : > { %p1810_p8 = pnand %p1221_p5, %p97_p7  ;;  %s109_s19 = sshll.u32 %s1732_s18, 4  ;;  %s1814_s19 = int_to_ptr.vmem [resolvable:$true] %s109_s19 }
   0xe   : > { %s1826_s21 = sadd.s32 1, %s1730_s12   ;;  %s26_s22 = sadd.s32 1, %s1726_s11 }
   0xf   : > { %s2060_s17 = scalar_select %p1810_p8, 1, 0 }
  0x10   : > { %p1528_p9 = pneg %p1810_p8  ;;  %s23_s23 = ssub.s32 %s1730_s12, %s1826_s21 }
  0x11   : > { %s1602_s26 = scalar_lea.hbm %s2053_s1, 20224 }
  0x12   : > { %p1821_p11 = pnand %p1528_p9, %p2055_p1  ;;  %p1603_p12 = scmp.ne.s32.totalorder %s2053_s1, %s1602_s26 }
  0x13   : > { %p1609_p5 = scmp.lt.u32.totalorder %s1602_s26, %s2053_s1 }
  0x14   : > { %p1604_p13 = pneg %p1821_p11 }
  0x16   : > { %p1605_p0 = pnand %p1604_p13, %p1603_p12 }
  0x18   : > { %p1606_p3 = pneg %p1605_p0 }
  0x1a   : > { %p1611_p7 = pnand %p1609_p5, %p1606_p3 }
  0x1c   : > { %1614 = shalt.err (!%p1611_p7)
}
  0x1d   : > { %s1615_s3 = scalar_lea.vmem %s1814_s19, 20224  ;;  %p1623_p2 = scmp.lt.s32.totalorder %s1814_s19, %s1814_s19 }
  0x1e   : > { %p1616_p9 = scmp.ne.s32.totalorder %s1814_s19, %s1615_s3  ;;  %p1624_p6 = scmp.lt.s32.totalorder %s1615_s3, %s1615_s3 }
  0x20   : > { %p1618_p10 = pnand %p1616_p9, %p1604_p13  ;;  %p1625_p4 = por %p1624_p6, %p1623_p2 }
  0x22   : > { %p1619_p1 = pneg %p1618_p10 }
  0x24   : > { %p1626_p8 = pnand %p1625_p4, %p1619_p1 }
  0x26   : > { %1629 = shalt.err (!%p1626_p8)
}
  0x27   : > { %s1733_s4 = smov 256   ;;  %s1734_s5 = smov 16  }
  0x28   : > { %1531 = dma.hbm_to_vmem [thread:$0]  (!%p1821_p11), %s2053_s1, 20224, %s1814_s19, [#allocation6], %s1733_s4, %s1733_s4, %s1734_s5  }
  0x29   : > { %p24_p2 = scmp.eq.s32.totalorder %s23_s23, 0  ;;  %p33_p1 = scmp.ne.s32.totalorder %s1726_s11, %s1722_s10 }
  0x2a   : > { %p34_p4 = scmp.eq.s32.totalorder %s1730_s12, 0  ;;  %p1541_p6 = scmp.lt.s32.totalorder %s1730_s12, 2 }
  0x2b   : > { %s1857_s8 = scalar_select %p24_p2, %s1726_s11, %s26_s22  }
  0x2c   : > { %p35_p8 = por %p34_p4, %p33_p1  ;;  %p2062_p10 = scmp.eq.s32.totalorder %s1791_s13, 1 }
  0x2d   : > { %s123_s18 = sand.u32 1, %s1726_s11   ;;  %s1245_s24 = sshll.u32 %s1730_s12, 8 }
  0x2e   : > { %p1861_p12 = por %p2062_p10, %p33_p1  ;;  %s1224_s25 = sshll.u32 %s123_s18, 4 }
  0x2f   : > { %s1870_s27 = scalar_lea.hbm %s2052_s0, %s1245_s24  ;;  %s127_s19 = scalar_lea.vmem [#allocation2], %s1224_s25 }
  0x30   : > { %s135_s22 = sshll.u32 %s127_s19, 4  ;;  %p1872_p11 = pnand %p1541_p6, %p35_p8  ;;  %s1876_s22 = int_to_ptr.vmem [resolvable:$true] %s135_s22 }
  0x31   : > { %s124_s28 = scalar_lea.sflag [#allocation3], %s123_s18  ;;  %s1630_s29 = scalar_lea.hbm %s1870_s27, 256 }
  0x32   : > { %p1631_p13 = scmp.ne.s32.totalorder %s1870_s27, %s1630_s29  ;;  %p1632_p0 = pneg %p1872_p11 }
  0x33   : > { %s1635_s4 = scalar_lea.hbm %s2052_s0, 512  ;;  %p1636_p7 = scmp.lt.u32.totalorder %s1870_s27, %s2052_s0 }
  0x34   : > { %p1633_p3 = pnand %p1632_p0, %p1631_p13  ;;  %p1637_p9 = scmp.lt.u32.totalorder %s1635_s4, %s1630_s29 }
  0x35   : > { %p1639_p1 = scmp.lt.u32.totalorder %s1630_s29, %s1870_s27 }
  0x36   : > { %p1634_p5 = pneg %p1633_p3  ;;  %p1638_p2 = por %p1637_p9, %p1636_p7 }
  0x38   : > { %p1640_p4 = por %p1639_p1, %p1638_p2 }
  0x3a   : > { %p1641_p6 = pnand %p1640_p4, %p1634_p5 }
  0x3c   : > { %1644 = shalt.err (!%p1641_p6)
}
  0x3d   : > { %s1645_s7 = scalar_lea.vmem %s1876_s22, 256  ;;  %s1735_s18 = smov [#allocation2]  }
  0x3e   : > { %p1646_p8 = scmp.ne.s32.totalorder %s1876_s22, %s1645_s7  ;;  %s1650_s24 = sshll.u32 %s1735_s18, 4  ;;  %s1651_s24 = int_to_ptr.vmem [resolvable:$false] %s1650_s24 }
  0x3f   : > { %s1652_s25 = scalar_lea.vmem %s1651_s24, 512  ;;  %p1653_p3 = scmp.lt.s32.totalorder %s1876_s22, %s1651_s24 }
  0x40   : > { %p1648_p10 = pnand %p1646_p8, %p1632_p0  ;;  %p1654_p7 = scmp.lt.s32.totalorder %s1652_s25, %s1645_s7 }
  0x42   : > { %p1649_p13 = pneg %p1648_p10  ;;  %p1655_p9 = por %p1654_p7, %p1653_p3 }
  0x44   : > { %p1656_p2 = pnand %p1655_p9, %p1649_p13 }
  0x46   : > { %1659 = shalt.err (!%p1656_p2)
}
  0x47   : > { %1535 = dma.hbm_to_vmem [thread:$0]  (!%p1872_p11), %s1870_s27, 256, %s1876_s22, %s124_s28  }
  0x48   : > { %p2065_p5 = scmp.ne.s32.totalorder %s2060_s17, 0 }
  0x49   : > { %s1906_s20 = sand.u32 (!%p2065_p5), 1, %s1722_s10   ;;  %p2066_p0 = scmp.ne.s32.totalorder (!%p2065_p5), %s2058_s15, 0 }
  0x4a   : > { %144 = sbr.rel (%p2065_p5) target bundleno = 2406 (0x966), region = 28  ;;  %s1228_s26 = sshll.u32 (!%p2065_p5), %s1906_s20, 4 }
  0x4b   : > { %s147_s19 = scalar_lea.sflag (!%p2065_p5), [#allocation3], %s1906_s20  ;;  %s150_s29 = scalar_lea.vmem (!%p2065_p5), [#allocation2], %s1228_s26 }
  0x51   : > { %1705 = dma.done.wait (%p2066_p0), %s147_s19, 256  }
  0x52   : > { %1707 = vsyncadd (%p2066_p0), %s147_s19, 4294967040  ;;  %p2067_p1 = scmp.eq.s32.totalorder %s1791_s13, 0 }
  0x54   : > { %1709 = dma.done.wait (%p2067_p1), [#allocation6], 20224   ;;  %p2068_p11 = pmov %p2067_p1 }
  0x55   : > { %v1918_v0 = vld [vmem:[%s150_s29] sm:$0xff]  ;;  %s1736_s17 = smov 16   ;;  %s1737_s27 = smov 17   ;;  %v1922_v1 = vld [vmem:[%s150_s29 + $0x8] sm:$0xff]  ;;  %v1742_v2 = vmov 0.0   ;;  %v181_v3 = vlaneseq  ;;  %vm274_vm8 = vcmask 654336  }
  0x56   : > { %1711 = vsyncadd (%p2068_p11), [#allocation6], 4294947072  ;;  %190 = vrot.lane.b32.xlu1 %v1918_v0, %s1736_s17  ;;  %177 = vrot.lane.b32.xlu0 %v1918_v0, %s1737_s27  ;;  %s1738_s15 = smov 15   ;;  %s1739_s22 = smov 1   ;;  %v197_v7 = vld [vmem:[#allocation5 + $0x10] sm:$0xff]  ;;  %v186_v8 = vld [vmem:[#allocation5] sm:$0xff] }
  0x57   : > { %s1740_s23 = smov 127   ;;  %s1741_s28 = smov 113   ;;  %342 = vmatprep.mubr.f32.mxu0 %v1742_v2  ;;  %527 = vmatprep.mubr.f32.mxu1 %v1742_v2  ;;  %v1946_v4 = vand.u32 127, %v181_v3  ;;  %v187_v9 = vld [vmem:[#allocation5 + $0x8] sm:$0xff]  ;;  %v198_v10 = vld [vmem:[#allocation5 + $0x18] sm:$0xff]  ;;  %v208_v25 = vld [vmem:[#allocation5 + $0x20] sm:$0xff] }
  0x58   : > { %s1743_s30 = smov 112   ;;  %s1744_s3 = smov 111   ;;  %v209_v26 = vld [vmem:[#allocation5 + $0x28] sm:$0xff]  ;;  %v219_v29 = vld [vmem:[#allocation5 + $0x30] sm:$0xff]  ;;  %v220_v30 = vld [vmem:[#allocation5 + $0x38] sm:$0xff]  ;;  %vm385_vm9 = vcmask 64512  }
  0x59   : > { %vm194_vm0 = vcmp.lt.s32.totalorder %v1946_v4, 16  ;;  %vm183_vm1 = vcmp.lt.s32.totalorder %v1946_v4, 17  ;;  %vm205_vm2 = vcmp.lt.s32.totalorder %v1946_v4, 15  ;;  %vm216_vm3 = vcmp.lt.s32.totalorder %v1946_v4, 1  ;;  %v224_v35 = vld [vmem:[#allocation5 + $0x48] sm:$0xff]  ;;  %v223_v36 = vld [vmem:[#allocation5 + $0x40] sm:$0xff] }
  0x5a   : > { %192 = vrot.lane.b32.xlu1 %v1922_v1, %s1736_s17  ;;  %179 = vrot.lane.b32.xlu0 %v1922_v1, %s1737_s27  ;;  %vm231_vm4 = vcmp.lt.s32.totalorder %v1946_v4, 127  ;;  %v234_v41 = vld [vmem:[#allocation5 + $0x50] sm:$0xff]  ;;  %v235_v42 = vld [vmem:[#allocation5 + $0x58] sm:$0xff]  ;;  %v226_v47 = vmul.f32 %v224_v35, %v1922_v1  ;;  %v225_v48 = vmul.f32 %v223_v36, %v1918_v0  ;;  %vm242_vm5 = vcmp.lt.s32.totalorder %v1946_v4, 113  ;;  %v245_v57 = vld [vmem:[#allocation5 + $0x60] sm:$0xff]  ;;  %s1745_s4 = smov 8  }
  0x5b   : > { %vm253_vm6 = vcmp.lt.s32.totalorder %v1946_v4, 112  ;;  %v246_v58 = vld [vmem:[#allocation5 + $0x68] sm:$0xff]  ;;  %v256_v61 = vld [vmem:[#allocation5 + $0x70] sm:$0xff]  ;;  %v257_v62 = vld [vmem:[#allocation5 + $0x78] sm:$0xff]  ;;  %vm264_vm7 = vcmp.lt.s32.totalorder %v1946_v4, 111  ;;  %s1746_s5 = smov 9  }
  0x5c   : > { %s1747_s6 = smov 7   ;;  %s1748_s7 = smov 121   ;;  %vm786_vm10 = vcmask 130048   ;;  %vm1752_vm11 = vmmov 0  }
  0x5d   : > { %s1749_s18 = smov 119   ;;  %s1750_s24 = smov 120  }
  0x5e   : > { %203 = vrot.lane.b32.xlu1 %v1922_v1, %s1738_s15  ;;  %201 = vrot.lane.b32.xlu0 %v1918_v0, %s1738_s15  ;;  %s1230_s25 = sshll.u32 %s1906_s20, 3  ;;  %s1242_s26 = sshll.u32 %s1791_s13, 7 }
  0x5f   : > { %s174_s19 = scalar_lea.vmem [#allocation7], %s1230_s25  ;;  %s2008_s15 = scalar_lea.hbm %s2054_s2, %s1242_s26 }
  0x60   : > { %s1140_s29 = sshll.u32 %s174_s19, 4  ;;  %s1754_s13 = smov [#allocation7]   ;;  %s2010_s29 = int_to_ptr.vmem [resolvable:$true] %s1140_s29 }
  0x62   : > { %214 = vrot.lane.b32.xlu1 %v1922_v1, %s1739_s22  ;;  %212 = vrot.lane.b32.xlu0 %v1918_v0, %s1739_s22 }
  0x66   : > { %229 = vrot.lane.b32.xlu1 %v1922_v1, %s1740_s23  ;;  %227 = vrot.lane.b32.xlu0 %v1918_v0, %s1740_s23 }
  0x6a   : > { %240 = vrot.lane.b32.xlu1 %v1922_v1, %s1741_s28  ;;  %238 = vrot.lane.b32.xlu0 %v1918_v0, %s1741_s28  ;;  %s1664_s28 = sshll.u32 %s1754_s13, 4  ;;  %s1665_s28 = int_to_ptr.vmem [resolvable:$false] %s1664_s28 }
  0x6b   : > { %p1667_p10 = scmp.lt.s32.totalorder %s2010_s29, %s1665_s28 }
  0x6e   : > { %251 = vrot.lane.b32.xlu1 %v1922_v1, %s1743_s30  ;;  %249 = vrot.lane.b32.xlu0 %v1918_v0, %s1743_s30 }
  0x72   : > { %262 = vrot.lane.b32.xlu1 %v1922_v1, %s1744_s3  ;;  %260 = vrot.lane.b32.xlu0 %v1918_v0, %s1744_s3 }
  0xc8   : > { %v191_v5 = vpop.permute.xlu1 %190  ;;  %v178_v6 = vpop.permute.xlu0 %177 }
  0xcc   : > { %v193_v11 = vpop.permute.xlu1 %192  ;;  %v180_v12 = vpop.permute.xlu0 %179 }
  0xcd   : > { %v195_v13 = vsel %vm194_vm0, %v191_v5, %v193_v11  ;;  %v196_v14 = vsel %vm194_vm0, %v193_v11, %v191_v5  ;;  %v184_v15 = vsel %vm183_vm1, %v178_v6, %v180_v12  ;;  %v185_v16 = vsel %vm183_vm1, %v180_v12, %v178_v6 }
  0xce   : > { %v199_v17 = vmul.f32 %v197_v7, %v196_v14  ;;  %v188_v18 = vmul.f32 %v186_v8, %v185_v16  ;;  %v189_v19 = vmul.f32 %v187_v9, %v184_v15  ;;  %v200_v20 = vmul.f32 %v198_v10, %v195_v13  ;;  %v267_v9 = vld [vmem:[#allocation5 + $0x80] sm:$0xff]  ;;  %v268_v10 = vld [vmem:[#allocation5 + $0x88] sm:$0xff] }
  0xd0   : > { %v204_v21 = vpop.permute.xlu1 %203  ;;  %v202_v22 = vpop.permute.xlu0 %201  ;;  %v1401_v23 = vpack.c.bf16 %v200_v20, %v189_v19  ;;  %v1403_v24 = vpack.c.bf16 %v199_v17, %v188_v18  ;;  %v272_v17 = vld [vmem:[#allocation5 + $0x98] sm:$0xff]  ;;  %v271_v18 = vld [vmem:[#allocation5 + $0x90] sm:$0xff] }
  0xd1   : > { %v206_v27 = vsel %vm205_vm2, %v202_v22, %v204_v21  ;;  %v207_v28 = vsel %vm205_vm2, %v204_v21, %v202_v22 }
  0xd2   : > { %1402 = vmatprep.subr.bf16.mxu0 %v1401_v23  ;;  %v210_v37 = vmul.f32 %v208_v25, %v207_v28  ;;  %v211_v38 = vmul.f32 %v209_v26, %v206_v27  ;;  %v273_v23 = vld [vmem:[#allocation5 + $0x2a0] sm:$0xff] }
  0xd3   : > { %1404 = vmatpush1.bf16.msra.mxu0 %v1403_v24 }
  0xd4   : > { %v215_v31 = vpop.permute.xlu1 %214  ;;  %v213_v32 = vpop.permute.xlu0 %212 }
  0xd5   : > { %v217_v33 = vsel %vm216_vm3, %v213_v32, %v215_v31  ;;  %v218_v34 = vsel %vm216_vm3, %v215_v31, %v213_v32 }
  0xd6   : > { %v221_v39 = vmul.f32 %v219_v29, %v218_v34  ;;  %v222_v40 = vmul.f32 %v220_v30, %v217_v33 }
  0xd8   : > { %v230_v43 = vpop.permute.xlu1 %229  ;;  %v228_v44 = vpop.permute.xlu0 %227  ;;  %v1405_v45 = vpack.c.bf16 %v222_v40, %v211_v38  ;;  %v1407_v46 = vpack.c.bf16 %v221_v39, %v210_v37 }
  0xd9   : > { %v232_v49 = vsel %vm231_vm4, %v228_v44, %v230_v43  ;;  %v233_v50 = vsel %vm231_vm4, %v230_v43, %v228_v44 }
  0xda   : > { %v236_v51 = vmul.f32 %v234_v41, %v232_v49  ;;  %v237_v52 = vmul.f32 %v235_v42, %v233_v50  ;;  %1406 = vmatprep.subr.bf16.mxu0 %v1405_v45  ;;  %v550_v50 = vld [vmem:[#allocation5 + $0x1a0] sm:$0xff] }
  0xdb   : > { %1408 = vmatpush1.bf16.msra.mxu0 %v1407_v46 }
  0xdc   : > { %v241_v53 = vpop.permute.xlu1 %240  ;;  %v239_v54 = vpop.permute.xlu0 %238  ;;  %v1409_v55 = vpack.c.bf16 %v237_v52, %v226_v47  ;;  %v1411_v56 = vpack.c.bf16 %v236_v51, %v225_v48  ;;  %v551_v51 = vld [vmem:[#allocation5 + $0x1b0] sm:$0xff]  ;;  %v534_v52 = vld [vmem:[#allocation5 + $0xa0] sm:$0xff] }
  0xdd   : > { %v243_v59 = vsel %vm242_vm5, %v239_v54, %v241_v53  ;;  %v244_v60 = vsel %vm242_vm5, %v241_v53, %v239_v54  ;;  %v535_v53 = vld [vmem:[#allocation5 + $0xb0] sm:$0xff] }
  0xde   : > { %1410 = vmatprep.subr.bf16.mxu0 %v1409_v55  ;;  %v247_v5 = vmul.f32 %v245_v57, %v243_v59  ;;  %v248_v6 = vmul.f32 %v246_v58, %v244_v60  ;;  %v552_v58 = vld [vmem:[#allocation5 + $0x1c0] sm:$0xff]  ;;  %v553_v59 = vld [vmem:[#allocation5 + $0x1d0] sm:$0xff]  ;;  %v1423_v4 = vpack.c.bf16 %v535_v53, %v534_v52 }
  0xdf   : > { %1412 = vmatpush1.bf16.msra.mxu0 %v1411_v56  ;;  %v384_v60 = vld [vmem:[#allocation5 + $0x2c0] sm:$0xff]  ;;  %v638_v52 = vld [vmem:[#allocation5 + $0x2d0] sm:$0xff] }
  0xe0   : > { %v252_v63 = vpop.permute.xlu1 %251  ;;  %v250_v0 = vpop.permute.xlu0 %249 }
  0xe1   : > { %v254_v1 = vsel %vm253_vm6, %v250_v0, %v252_v63  ;;  %v255_v3 = vsel %vm253_vm6, %v252_v63, %v250_v0  ;;  %v1425_v63 = vpack.c.bf16 %v553_v59, %v552_v58  ;;  %v536_v0 = vld [vmem:[#allocation5 + $0xc0] sm:$0xff]  ;;  %v646_v58 = vld [vmem:[#allocation5 + $0x2f0] sm:$0xff] }
  0xe2   : > { %v258_v7 = vmul.f32 %v256_v61, %v254_v1  ;;  %v259_v8 = vmul.f32 %v257_v62, %v255_v3  ;;  %v383_v61 = vld [vmem:[#allocation5 + $0x2b0] sm:$0xff]  ;;  %v1421_v62 = vpack.c.bf16 %v551_v51, %v550_v50  ;;  %v554_v3 = vld [vmem:[#allocation5 + $0x1e0] sm:$0xff] }
  0xe3   : > { %v537_v1 = vld [vmem:[#allocation5 + $0xd0] sm:$0xff]  ;;  %v642_v51 = vld [vmem:[#allocation5 + $0x2e0] sm:$0xff] }
  0xe4   : > { %v263_v11 = vpop.permute.xlu1 %262  ;;  %v261_v12 = vpop.permute.xlu0 %260  ;;  %v1413_v13 = vpack.c.bf16 %v259_v8, %v248_v6  ;;  %v1415_v14 = vpack.c.bf16 %v258_v7, %v247_v5  ;;  %v555_v5 = vld [vmem:[#allocation5 + $0x1f0] sm:$0xff]  ;;  %v1427_v6 = vpack.c.bf16 %v537_v1, %v536_v0  ;;  %v538_v8 = vld [vmem:[#allocation5 + $0xe0] sm:$0xff] }
  0xe5   : > { %v265_v15 = vsel %vm264_vm7, %v261_v12, %v263_v11  ;;  %v266_v16 = vsel %vm264_vm7, %v263_v11, %v261_v12  ;;  %v1429_v7 = vpack.c.bf16 %v555_v5, %v554_v3  ;;  %v557_v11 = vld [vmem:[#allocation5 + $0x210] sm:$0xff]  ;;  %v656_v0 = vld [vmem:[#allocation5 + $0x320] sm:$0xff] }
  0xe6   : > { %v269_v19 = vmul.f32 %v267_v9, %v265_v15  ;;  %v270_v20 = vmul.f32 %v268_v10, %v266_v16  ;;  %1414 = vmatprep.subr.bf16.mxu0 %v1413_v13  ;;  %v539_v9 = vld [vmem:[#allocation5 + $0xf0] sm:$0xff]  ;;  %v556_v10 = vld [vmem:[#allocation5 + $0x200] sm:$0xff] }
  0xe7   : > { %1416 = vmatpush1.bf16.msra.mxu0 %v1415_v14  ;;  %v1431_v12 = vpack.c.bf16 %v539_v9, %v538_v8  ;;  %v1433_v13 = vpack.c.bf16 %v557_v11, %v556_v10  ;;  %v540_v14 = vld [vmem:[#allocation5 + $0x100] sm:$0xff]  ;;  %v541_v15 = vld [vmem:[#allocation5 + $0x110] sm:$0xff] }
  0xe8   : > { %v1417_v21 = vpack.c.bf16 %v272_v17, %v270_v20  ;;  %v1419_v22 = vpack.c.bf16 %v271_v18, %v269_v19  ;;  %v558_v16 = vld [vmem:[#allocation5 + $0x220] sm:$0xff]  ;;  %v559_v17 = vld [vmem:[#allocation5 + $0x230] sm:$0xff]  ;;  %v1435_v18 = vpack.c.bf16 %v541_v15, %v540_v14 }
  0xe9   : > { %v1437_v19 = vpack.c.bf16 %v559_v17, %v558_v16  ;;  %v542_v20 = vld [vmem:[#allocation5 + $0x120] sm:$0xff]  ;;  %v671_v50 = vld [vmem:[#allocation5 + $0x470] sm:$0xff] }
  0xea   : > { %1418 = vmatprep.subr.bf16.mxu0 %v1417_v21  ;;  %v543_v21 = vld [vmem:[#allocation5 + $0x130] sm:$0xff]  ;;  %v664_v10 = vld [vmem:[#allocation5 + $0x340] sm:$0xff] }
  0xeb   : > { %1420 = vmatpush1.bf16.msra.mxu0 %v1419_v22  ;;  %v560_v22 = vld [vmem:[#allocation5 + $0x240] sm:$0xff]  ;;  %v660_v8 = vld [vmem:[#allocation5 + $0x330] sm:$0xff] }
  0xec   : > { %v668_v9 = vld [vmem:[#allocation5 + $0x350] sm:$0xff]  ;;  %v670_v17 = vld [vmem:[#allocation5 + $0x360] sm:$0xff] }
  0xee   : > { %1231 = vmatmul.mubr.msk.f32.vlgmr.msra.gmra.mrb[0].mxu0 %vm274_vm8, %v273_v23  ;;  %v561_v23 = vld [vmem:[#allocation5 + $0x250] sm:$0xff] }
  0xef   : > { %453 = vmatprep.mubr.f32.mxu0 %v1742_v2 }
 0x1c1   : > { %v344_v24 = vpop.f32.mrb[0].mxu0 }
 0x1c2   : > { %v349_v25 = vmax.f32 %v344_v24, 0.0  ;;  %v346_v26 = vpop.f32.mrb[1].mxu0  ;;  %v1439_v24 = vpack.c.bf16 %v543_v21, %v542_v20  ;;  %v672_v20 = vld [vmem:[#allocation5 + $0x480] sm:$0xff] }
 0x1c3   : > { %v350_v27 = vmax.f32 %v346_v26, 0.0  ;;  %v544_v26 = vld [vmem:[#allocation5 + $0x140] sm:$0xff] }
 0x1c4   : > { %357 = vrot.lane.b32.xlu0 %v349_v25, %s1743_s30 }
 0x1c5   : > { %359 = vrot.lane.b32.xlu1 %v350_v27, %s1743_s30  ;;  %s1666_s30 = scalar_lea.vmem %s1665_s28, 256 }
 0x1c8   : > { %351 = vrot.lane.b32.xlu0 %v349_v25, %s1740_s23 }
 0x1c9   : > { %353 = vrot.lane.b32.xlu1 %v350_v27, %s1740_s23 }
 0x236   : > { %v358_v28 = vpop.permute.xlu0 %357 }
 0x237   : > { %v360_v29 = vpop.permute.xlu1 %359 }
 0x238   : > { %v362_v30 = vsel %vm253_vm6, %v360_v29, %v358_v28  ;;  %v361_v31 = vsel %vm253_vm6, %v358_v28, %v360_v29  ;;  %v562_v28 = vld [vmem:[#allocation5 + $0x260] sm:$0xff]  ;;  %v563_v29 = vld [vmem:[#allocation5 + $0x270] sm:$0xff] }
 0x239   : > { %365 = vrot.lane.b32.xlu1 %v362_v30, %s1740_s23  ;;  %363 = vrot.lane.b32.xlu0 %v361_v31, %s1740_s23 }
 0x23a   : > { %v352_v32 = vpop.permute.xlu0 %351 }
 0x23b   : > { %v354_v33 = vpop.permute.xlu1 %353 }
 0x23c   : > { %v355_v34 = vsel %vm231_vm4, %v352_v32, %v354_v33  ;;  %v356_v35 = vsel %vm231_vm4, %v354_v33, %v352_v32  ;;  %v546_v32 = vld [vmem:[#allocation5 + $0x160] sm:$0xff]  ;;  %v547_v33 = vld [vmem:[#allocation5 + $0x170] sm:$0xff] }
 0x23d   : > { %v369_v36 = vadd.f32 %v355_v34, %v349_v25  ;;  %v370_v37 = vadd.f32 %v356_v35, %v350_v27  ;;  %v377_v42 = vmax.f32 %v349_v25, %v355_v34  ;;  %v378_v43 = vmax.f32 %v350_v27, %v356_v35  ;;  %v545_v27 = vld [vmem:[#allocation5 + $0x150] sm:$0xff]  ;;  %v564_v35 = vld [vmem:[#allocation5 + $0x280] sm:$0xff] }
 0x23e   : > { %v1441_v25 = vpack.c.bf16 %v561_v23, %v560_v22  ;;  %v1447_v34 = vpack.c.bf16 %v547_v33, %v546_v32 }
 0x23f   : > { %v372_v40 = vadd.f32 %v370_v37, %v362_v30  ;;  %v371_v41 = vadd.f32 %v369_v36, %v361_v31  ;;  %v565_v36 = vld [vmem:[#allocation5 + $0x290] sm:$0xff] }
 0x240   : > { %v1449_v37 = vpack.c.bf16 %v565_v36, %v564_v35 }
 0x2ab   : > { %v364_v38 = vpop.permute.xlu0 %363  ;;  %v366_v39 = vpop.permute.xlu1 %365 }
 0x2ac   : > { %v367_v44 = vsel %vm231_vm4, %v364_v38, %v366_v39  ;;  %v368_v45 = vsel %vm231_vm4, %v366_v39, %v364_v38  ;;  %v548_v38 = vld [vmem:[#allocation5 + $0x180] sm:$0xff]  ;;  %v549_v39 = vld [vmem:[#allocation5 + $0x190] sm:$0xff] }
 0x2ad   : > { %v379_v46 = vmax.f32 %v361_v31, %v367_v44  ;;  %v380_v47 = vmax.f32 %v362_v30, %v368_v45  ;;  %v374_v48 = vadd.f32 %v372_v40, %v368_v45  ;;  %v373_v49 = vadd.f32 %v371_v41, %v367_v44 }
 0x2ae   : > { %v1443_v30 = vpack.c.bf16 %v545_v27, %v544_v26  ;;  %v1445_v31 = vpack.c.bf16 %v563_v29, %v562_v28  ;;  %v1451_v40 = vpack.c.bf16 %v549_v39, %v548_v38  ;;  %v782_v26 = vld [vmem:[#allocation5 + $0x490] sm:$0xff] }
 0x2af   : > { %v381_v54 = vmax.f32 %v377_v42, %v379_v46  ;;  %v382_v55 = vmax.f32 %v378_v43, %v380_v47  ;;  %v376_v56 = vmul.f32 0.25, %v374_v48  ;;  %v375_v57 = vmul.f32 0.25, %v373_v49 }
 0x2b1   : > { %389 = vmatprep.subr.mxu0 %v382_v55  ;;  %463 = vmatprep.subr.mxu1 %v376_v56 }
 0x2b2   : > { %390 = vmatpush1.msra.mxu0 %v381_v54  ;;  %464 = vmatpush1.msra.mxu1 %v375_v57  ;;  %v650_v57 = vld [vmem:[#allocation5 + $0x300] sm:$0xff] }
 0x2b3   : > { %1232 = vmatmul.mubr.msk.f32.vlgmr.msra.gmra.mrb[2].mxu0 %vm385_vm9, %v384_v60  ;;  %1233 = vmatmul.mubr.msk.f32.vlgmr.msra.gmra.mrb[0].mxu1 %vm385_vm9, %v383_v61 }
 0x2b4   : > { %1422 = vmatprep.subr.bf16.mxu1 %v1421_v62 }
 0x2b5   : > { %1424 = vmatpush3.bf16.msra.mxu1 %v1423_v4 }
 0x2b6   : > { %1426 = vmatprep.subr.bf16.mxu1 %v1425_v63  ;;  %v652_v63 = vld [vmem:[#allocation5 + $0x310] sm:$0xff] }
 0x2b9   : > { %1428 = vmatpush3.bf16.msra.mxu1 %v1427_v6 }
 0x2ba   : > { %1430 = vmatprep.subr.bf16.mxu1 %v1429_v7 }
 0x2bd   : > { %1432 = vmatpush3.bf16.msra.mxu1 %v1431_v12 }
 0x2be   : > { %1434 = vmatprep.subr.bf16.mxu1 %v1433_v13 }
 0x2c1   : > { %1436 = vmatpush3.bf16.msra.mxu1 %v1435_v18 }
 0x2c2   : > { %1438 = vmatprep.subr.bf16.mxu1 %v1437_v19 }
 0x2c5   : > { %1440 = vmatpush3.bf16.msra.mxu1 %v1439_v24 }
 0x2c6   : > { %1442 = vmatprep.subr.bf16.mxu1 %v1441_v25  ;;  %v784_v25 = vld [vmem:[#allocation5 + $0x4b0] sm:$0xff] }
 0x2c7   : > { %1349 = vmatprep.mubr.msk.f32.mxu0 %vm786_vm10, %v784_v25 }
 0x2c9   : > { %1444 = vmatpush3.bf16.msra.mxu1 %v1443_v30 }
 0x2ca   : > { %1446 = vmatprep.subr.bf16.mxu1 %v1445_v31 }
 0x2cd   : > { %1448 = vmatpush3.bf16.msra.mxu1 %v1447_v34 }
 0x2ce   : > { %1450 = vmatprep.subr.bf16.mxu1 %v1449_v37 }
 0x2d1   : > { %1452 = vmatpush3.bf16.msra.mxu1 %v1451_v40 }
 0x386   : > { %v455_v41 = vpop.f32.mrb[2].mxu0  ;;  %v529_v42 = vpop.f32.mrb[0].mxu1 }
 0x387   : > { %v530_v43 = vadd.f32 %v529_v42, %v455_v41  ;;  %v457_v44 = vpop.f32.mrb[3].mxu0  ;;  %v531_v45 = vpop.f32.mrb[1].mxu1 }
 0x388   : > { %v532_v46 = vadd.f32 %v531_v45, %v457_v44  ;;  %v949_v45 = vld [vmem:[#allocation5 + $0x370] sm:$0xff] }
 0x38a   : > { %630 = vmatprep.mubr.f32.mxu1 %v532_v46  ;;  %v950_v46 = vld [vmem:[#allocation5 + $0x380] sm:$0xff] }
 0x38b   : > { %631 = vmatmul.mubr.f32.vlgmr.msra.gmra.mrb[2].mxu1 %v530_v43 }
 0x38c   : > { %1342 = vmatprep.mubr.msk.f32.mxu1 %vm274_vm8, %v671_v50 }
 0x45e   : > { %v1278_v47 = vpop.f32.mrb[2].mxu1 }
 0x45f   : > { %v1279_v48 = vpop.f32.mrb[3].mxu1 }
 0x460   : > { %v1280_v49 = vadd.f32 %v1279_v48, %v1278_v47 }
 0x462   : > { %640 = vrot.lane.b32.xlu1 %v1280_v49, %s1745_s4  ;;  %636 = vrot.lane.b32.xlu0 %v1280_v49, %s1746_s5  ;;  %v653_v6 = vmul.f32 %v1280_v49, %v652_v63  ;;  %v958_v63 = vld [vmem:[#allocation5 + $0x400] sm:$0xff] }
 0x466   : > { %648 = vrot.lane.b32.xlu1 %v1280_v49, %s1739_s22  ;;  %644 = vrot.lane.b32.xlu0 %v1280_v49, %s1747_s6  ;;  %s1127_s22 = scalar_lea.sflag [#allocation4], %s1906_s20 }
 0x46a   : > { %658 = vrot.lane.b32.xlu1 %v1280_v49, %s1748_s7  ;;  %654 = vrot.lane.b32.xlu0 %v1280_v49, %s1740_s23 }
 0x46e   : > { %666 = vrot.lane.b32.xlu1 %v1280_v49, %s1749_s18  ;;  %662 = vrot.lane.b32.xlu0 %v1280_v49, %s1750_s24 }
 0x4d4   : > { %v641_v53 = vpop.permute.xlu1 %640  ;;  %v637_v54 = vpop.permute.xlu0 %636 }
 0x4d5   : > { %v643_v55 = vmul.f32 %v642_v51, %v641_v53  ;;  %v639_v56 = vmul.f32 %v638_v52, %v637_v54  ;;  %v1481_v51 = vpack.c.bf16 %v950_v46, %v949_v45  ;;  %v951_v52 = vld [vmem:[#allocation5 + $0x390] sm:$0xff]  ;;  %v952_v53 = vld [vmem:[#allocation5 + $0x3a0] sm:$0xff] }
 0x4d6   : > { %v785_v54 = vld [vmem:[#allocation5 + $0x4c0] sm:$0xff] }
 0x4d7   : > { %v1453_v59 = vpack.c.bf16 %v643_v55, %v639_v56  ;;  %v783_v55 = vld [vmem:[#allocation5 + $0x4a0] sm:$0xff]  ;;  %v1485_v56 = vpack.c.bf16 %v952_v53, %v951_v52 }
 0x4d8   : > { %v649_v60 = vpop.permute.xlu1 %648  ;;  %v645_v61 = vpop.permute.xlu0 %644 }
 0x4d9   : > { %v651_v62 = vmul.f32 %v650_v57, %v649_v60  ;;  %v647_v4 = vmul.f32 %v646_v58, %v645_v61  ;;  %1454 = vmatprep.subr.bf16.mxu1 %v1453_v59  ;;  %v953_v57 = vld [vmem:[#allocation5 + $0x3b0] sm:$0xff]  ;;  %v954_v58 = vld [vmem:[#allocation5 + $0x3c0] sm:$0xff] }
 0x4da   : > { %1456 = vmatpush3.bf16.msra.mxu1 %v1453_v59  ;;  %v1489_v59 = vpack.c.bf16 %v954_v58, %v953_v57  ;;  %v955_v60 = vld [vmem:[#allocation5 + $0x3d0] sm:$0xff]  ;;  %v956_v61 = vld [vmem:[#allocation5 + $0x3e0] sm:$0xff] }
 0x4db   : > { %v1457_v1 = vpack.c.bf16 %v651_v62, %v647_v4  ;;  %v1493_v62 = vpack.c.bf16 %v956_v61, %v955_v60  ;;  %v957_v4 = vld [vmem:[#allocation5 + $0x3f0] sm:$0xff] }
 0x4dc   : > { %v659_v3 = vpop.permute.xlu1 %658  ;;  %v655_v5 = vpop.permute.xlu0 %654 }
 0x4dd   : > { %v657_v7 = vmul.f32 %v656_v0, %v655_v5  ;;  %1458 = vmatprep.subr.bf16.mxu1 %v1457_v1  ;;  %v661_v14 = vmul.f32 %v660_v8, %v659_v3  ;;  %v1497_v0 = vpack.c.bf16 %v958_v63, %v957_v4  ;;  %v960_v3 = vld [vmem:[#allocation5 + $0x420] sm:$0xff] }
 0x4de   : > { %1460 = vmatpush3.bf16.msra.mxu1 %v1457_v1  ;;  %v959_v1 = vld [vmem:[#allocation5 + $0x410] sm:$0xff] }
 0x4df   : > { %v1461_v11 = vpack.c.bf16 %v657_v7, %v653_v6  ;;  %v1501_v5 = vpack.c.bf16 %v960_v3, %v959_v1  ;;  %v961_v6 = vld [vmem:[#allocation5 + $0x430] sm:$0xff]  ;;  %v962_v7 = vld [vmem:[#allocation5 + $0x440] sm:$0xff] }
 0x4e0   : > { %v667_v12 = vpop.permute.xlu1 %666  ;;  %v663_v13 = vpop.permute.xlu0 %662  ;;  %v1505_v8 = vpack.c.bf16 %v962_v7, %v961_v6 }
 0x4e1   : > { %v669_v15 = vmul.f32 %v668_v9, %v667_v12  ;;  %v665_v16 = vmul.f32 %v664_v10, %v663_v13  ;;  %1462 = vmatprep.subr.bf16.mxu1 %v1461_v11  ;;  %v963_v9 = vld [vmem:[#allocation5 + $0x450] sm:$0xff]  ;;  %v964_v10 = vld [vmem:[#allocation5 + $0x460] sm:$0xff] }
 0x4e2   : > { %1464 = vmatpush3.bf16.msra.mxu1 %v1461_v11  ;;  %v1509_v11 = vpack.c.bf16 %v964_v10, %v963_v9 }
 0x4e3   : > { %v1465_v18 = vpack.c.bf16 %v665_v16, %v661_v14  ;;  %v1469_v19 = vpack.c.bf16 %v670_v17, %v669_v15 }
 0x4e5   : > { %1466 = vmatprep.subr.bf16.mxu1 %v1465_v18 }
 0x4e6   : > { %1468 = vmatpush3.bf16.msra.mxu1 %v1465_v18  ;;  %v1751_v18 = vmov 0.0|0.0  }
 0x4e7   : > { %1470 = vmatprep.subr.bf16.mxu1 %v1469_v19 }
 0x4ea   : > { %1472 = vmatpush3.bf16.msra.mxu1 %v1469_v19  ;;  %v1041_v19 = vld [vmem:[#allocation5 + $0x4e0] sm:$0xff] }
 0x4ed   : > { %1343 = vmatmul.mubr.msk.f32.vlgmr.msra.gmra.mrb[4].mxu1 %vm274_vm8, %v672_v20  ;;  %v1753_v20 = vmov 0  }
 0x4ee   : > { %1356 = vmatprep.mubr.msk.f32.mxu1 %vm786_vm10, %v782_v26  ;;  %1597 = vset.pattern.permute.xlu0 %v1753_v20 }
 0x5c0   : > { %v1344_v21 = vpop.f32.mrb[4].mxu1 }
 0x5c1   : > { %v755_v22 = vmax.f32 %v1344_v21, 0.0  ;;  %v745_v23 = vpop.f32.mrb[5].mxu1 }
 0x5c2   : > { %v754_v24 = vmax.f32 %v745_v23, 0.0 }
 0x5c3   : > { %762 = vrot.lane.b32.xlu1 %v755_v22, %s1750_s24 }
 0x5c4   : > { %760 = vrot.lane.b32.xlu0 %v754_v24, %s1750_s24 }
 0x5c7   : > { %758 = vrot.lane.b32.xlu1 %v755_v22, %s1740_s23 }
 0x5c8   : > { %756 = vrot.lane.b32.xlu0 %v754_v24, %s1740_s23 }
 0x635   : > { %v763_v27 = vpop.permute.xlu1 %762 }
 0x636   : > { %766 = vrot.lane.b32.xlu1 %v763_v27, %s1740_s23  ;;  %v761_v28 = vpop.permute.xlu0 %760 }
 0x637   : > { %764 = vrot.lane.b32.xlu0 %v761_v28, %s1740_s23  ;;  %s1660_s23 = scalar_lea.vmem %s2010_s29, 128 }
 0x638   : > { %p1661_p4 = scmp.ne.s32.totalorder %s2010_s29, %s1660_s23  ;;  %p1668_p13 = scmp.lt.s32.totalorder %s1666_s30, %s1660_s23 }
 0x639   : > { %v759_v29 = vpop.permute.xlu1 %758 }
 0x63a   : > { %v757_v30 = vpop.permute.xlu0 %756  ;;  %v769_v31 = vadd.f32 %v759_v29, %v755_v22  ;;  %v777_v36 = vmax.f32 %v755_v22, %v759_v29  ;;  %p1662_p6 = pnand %p1661_p4, %p1861_p12  ;;  %p1669_p3 = por %p1668_p13, %p1667_p10 }
 0x63b   : > { %v768_v32 = vadd.f32 %v757_v30, %v754_v24  ;;  %v776_v40 = vmax.f32 %v754_v24, %v757_v30  ;;  %1044 = vperm.xlu0 %1597, %v1041_v19   ;;  %v1040_v24 = vld [vmem:[#allocation5 + $0x4d0] sm:$0xff] }
 0x63c   : > { %v771_v33 = vadd.f32 %v769_v31, %v763_v27  ;;  %p1663_p8 = pneg %p1662_p6 }
 0x63d   : > { %v770_v35 = vadd.f32 %v768_v32, %v761_v28 }
 0x63e   : > { %p1670_p7 = pnand %p1669_p3, %p1663_p8 }
 0x6a8   : > { %v767_v34 = vpop.permute.xlu1 %766 }
 0x6a9   : > { %v773_v37 = vadd.f32 %v771_v33, %v767_v34  ;;  %v779_v38 = vmax.f32 %v763_v27, %v767_v34  ;;  %v765_v39 = vpop.permute.xlu0 %764 }
 0x6aa   : > { %v772_v41 = vadd.f32 %v770_v35, %v765_v39  ;;  %v778_v42 = vmax.f32 %v761_v28, %v765_v39 }
 0x6ab   : > { %v775_v43 = vmul.f32 0.25, %v773_v37  ;;  %v781_v44 = vmax.f32 %v777_v36, %v779_v38 }
 0x6ac   : > { %v774_v47 = vmul.f32 0.25, %v772_v41  ;;  %v780_v48 = vmax.f32 %v776_v40, %v778_v42 }
 0x6ae   : > { %v1473_v49 = vpack.c.bf16 %v781_v44, %v780_v48  ;;  %v1477_v50 = vpack.c.bf16 %v775_v43, %v774_v47 }
 0x6b0   : > { %1474 = vmatprep.subr.bf16.mxu0 %v1473_v49  ;;  %1478 = vmatprep.subr.bf16.mxu1 %v1477_v50 }
 0x6b1   : > { %1476 = vmatpush3.bf16.msra.mxu0 %v1473_v49  ;;  %1480 = vmatpush3.bf16.msra.mxu1 %v1477_v50 }
 0x6b2   : > { %1482 = vmatprep.subr.bf16.mxu0 %v1481_v51  ;;  %1513 = vmatprep.subr.bf16.mxu1 %v1751_v18 }
 0x6b4   : > { %1350 = vmatmul.mubr.msk.f32.vlgmr.msra.gmra.mrb[4].mxu0 %vm786_vm10, %v785_v54  ;;  %1357 = vmatmul.mubr.msk.f32.vlgmr.msra.gmra.mrb[6].mxu1 %vm786_vm10, %v783_v55 }
 0x6b5   : > { %1484 = vmatpush3.bf16.msra.mxu0 %v1481_v51  ;;  %1398 = vmatprep.mubr.msk.f32.mxu1 %vm1752_vm11, %v1742_v2 }
 0x6b6   : > { %1486 = vmatprep.subr.bf16.mxu0 %v1485_v56 }
 0x6b9   : > { %1488 = vmatpush3.bf16.msra.mxu0 %v1485_v56 }
 0x6ba   : > { %1490 = vmatprep.subr.bf16.mxu0 %v1489_v59  ;;  %v1045_v25 = vpop.permute.xlu0 %1044 }
 0x6bd   : > { %1492 = vmatpush3.bf16.msra.mxu0 %v1489_v59 }
 0x6be   : > { %1494 = vmatprep.subr.bf16.mxu0 %v1493_v62 }
 0x6c1   : > { %1496 = vmatpush3.bf16.msra.mxu0 %v1493_v62 }
 0x6c2   : > { %1498 = vmatprep.subr.bf16.mxu0 %v1497_v0 }
 0x6c5   : > { %1500 = vmatpush3.bf16.msra.mxu0 %v1497_v0 }
 0x6c6   : > { %1502 = vmatprep.subr.bf16.mxu0 %v1501_v5 }
 0x6c9   : > { %1504 = vmatpush3.bf16.msra.mxu0 %v1501_v5 }
 0x6ca   : > { %1506 = vmatprep.subr.bf16.mxu0 %v1505_v8 }
 0x6cd   : > { %1508 = vmatpush3.bf16.msra.mxu0 %v1505_v8 }
 0x6ce   : > { %1510 = vmatprep.subr.bf16.mxu0 %v1509_v11 }
 0x6d1   : > { %1512 = vmatpush3.bf16.msra.mxu0 %v1509_v11 }
 0x787   : > { %v1351_v12 = vpop.f32.mrb[4].mxu0  ;;  %v1358_v13 = vpop.f32.mrb[6].mxu1 }
 0x788   : > { %v946_v14 = vadd.f32 %v1358_v13, %v1351_v12  ;;  %v859_v15 = vpop.f32.mrb[5].mxu0  ;;  %v940_v16 = vpop.f32.mrb[7].mxu1 }
 0x789   : > { %v941_v17 = vadd.f32 %v940_v16, %v859_v15 }
 0x78b   : > { %1391 = vmatprep.mubr.f32.mxu0 %v941_v17 }
 0x78c   : > { %1392 = vmatmul.mubr.f32.vlgmr.msra.gmra.mrb[6].mxu0 %v946_v14 }
 0x85f   : > { %v1393_v21 = vpop.f32.mrb[6].mxu0 }
 0x860   : > { %v1031_v22 = vpop.f32.mrb[7].mxu0 }
 0x861   : > { %v1514_v23 = vpack.c.bf16 %v1393_v21, %v1031_v22 }
 0x863   : > { %1515 = vmatpush3.bf16.msra.mxu1 %v1514_v23 }
 0x866   : > { %1399 = vmatmul.mubr.msk.f32.vlgmr.msra.gmra.mrb[8].mxu1 %vm786_vm10, %v1040_v24 }
 0x939   : > { %v1116_v26 = vpop.f32.mrb[8].mxu1 }
 0x93a   : > { %v1400_v27 = vpop.f32.mrb[9].mxu1  ;;  %v1117_v28 = vadd.f32 %v1116_v26, %v1045_v25 }
 0x93c   : > { %v1120_v29 = vsub.f32 0.0, %v1117_v28 }
 0x93e   : > { %v1121_v2 = vmul.f32 1.442695, %v1120_v29 }
 0x940   : > { %1598 = vpow2.f32 %v1121_v2 }
 0x94a   : > { %v1599_v30 = vpop.eup %1598 }
 0x94b   : > { %v1123_v31 = vadd.f32 1.0, %v1599_v30 }
 0x94d   : > { %1600 = vrcp.f32 %v1123_v31 }
 0x957   : > { %v1601_v32 = vpop.eup %1600 }
 0x958   : > { %1125 = vst [vmem:[%s174_s19] sm:$0xff] %v1601_v32 }
 0x959   : > { %1673 = shalt.err (!%p1670_p7)
}
 0x95a   : > { %s1674_s20 = scalar_lea.hbm %s2008_s15, 128  ;;  %s1678_s5 = scalar_lea.hbm %s2054_s2, 256 }
 0x95b   : > { %p1675_p9 = scmp.ne.s32.totalorder %s2008_s15, %s1674_s20  ;;  %p1679_p0 = scmp.lt.u32.totalorder %s2008_s15, %s2054_s2 }
 0x95c   : > { %p1680_p1 = scmp.lt.u32.totalorder %s1678_s5, %s1674_s20  ;;  %p1682_p4 = scmp.lt.u32.totalorder %s1674_s20, %s2008_s15 }
 0x95d   : > { %p1676_p2 = pnand %p1675_p9, %p1861_p12 }
 0x95e   : > { %p1681_p11 = por %p1680_p1, %p1679_p0 }
 0x95f   : > { %p1677_p5 = pneg %p1676_p2 }
 0x960   : > { %p1683_p6 = por %p1682_p4, %p1681_p11 }
 0x962   : > { %p1684_p8 = pnand %p1683_p6, %p1677_p5 }
 0x964   : > { %1687 = shalt.err (!%p1684_p8)
}
 0x965   : > { %1526 = dma.vmem_to_hbm [thread:$0]  (%p1861_p12), %s2010_s29, 128, %s2008_s15, %s1127_s22  }
 0x966 PF: > { %s1152_s18 = sand.u32 1, %s1718_s9   ;;  %p2069_p10 = scmp.ne.s32.totalorder %s2059_s16, 0 }
 0x967   : > { %p2070_p13 = scmp.ge.s32.totalorder %s1730_s12, 2  ;;  %s1153_s24 = scalar_lea.sflag [#allocation4], %s1152_s18 }
 0x969   : > { %p1537_p3 = pnand %p2070_p13, %p2069_p10 }
 0x96b   : > { %1713 = dma.done.wait (!%p1537_p3), %s1153_s24, 128  }
 0x96c   : > { %1715 = vsyncadd (!%p1537_p3), %s1153_s24, 4294967168  ;;  %p16_p7 = scmp.ge.s32.totalorder %s1826_s21, 4   ;;  %s2071_s9 = smov %s1722_s10 }
 0x96d   : > { %s2072_s10 = smov %s1726_s11  ;;  %s2073_s11 = smov %s1857_s8 }
 0x96e   : > { %s2074_s12 = smov %s1826_s21  ;;  %18 = sbr.rel (!%p16_p7) target bundleno = 6 (0x6), region = 77 }
 0x975   :  { %1158 = vsyncpa [#allocation3], 1 }
 0x976   :  { %1160 = vsyncpa [#allocation3 + $0x1], 1 }
 0x977   :  { %1161 = vsyncpa [#allocation6], 1 }
 0x978   :  { %1162 = vsyncpa [#allocation4], 1 }
 0x979   :  { %1164 = vsyncpa [#allocation4 + $0x1], 1 }

</bundles_post_ra>
